<compile_context>
chip_gen: v5e
topology: v5e:2x2
jax: 0.10.0
libtpu: 0.0.40
codegen_flags: <defaults>
</compile_context>

<pallas_src>
import jax
import jax.numpy as jnp
from jax import lax
from jax.experimental import pallas as pl
from jax.experimental.pallas import tpu as pltpu


def _round_up(v, m):
    return ((v + m - 1) // m) * m


def output_block_kernel(rbf_ref, x_ref, idx_ref, w_rbf_ref,
                        lins_w_ref, lins_b_ref, w_out_ref,
                        out_ref, acc_ref):
    n = pl.program_id(0)                 # node-tile index (parallel)
    e = pl.program_id(1)                 # edge-tile index (reduction)
    n_e = pl.num_programs(1)

    @pl.when(e == 0)
    def _():
        acc_ref[...] = jnp.zeros_like(acc_ref)

    # y = lin_rbf(rbf) * x   for this edge tile  (bf16 MXU, f32 accumulate)
    y = jnp.dot(rbf_ref[...], w_rbf_ref[...],
                preferred_element_type=jnp.float32)          # (tE, Hp)
    y = (y * x_ref[...].astype(jnp.float32)).astype(jnp.bfloat16)

    # scatter-sum of this edge tile into this node tile via one-hot matmul.
    tN = acc_ref.shape[0]
    tE = idx_ref.shape[1]
    node_iota = lax.broadcasted_iota(jnp.int32, (tN, tE), 0) + n * tN
    onehot = (node_iota == idx_ref[...]).astype(jnp.bfloat16)  # exact 0/1
    acc_ref[...] += jnp.dot(onehot, y, preferred_element_type=jnp.float32)

    # On the last edge tile: run the swish MLP + final linear for this node tile.
    @pl.when(e == n_e - 1)
    def _():
        h = acc_ref[...]                                      # (tN, Hp) f32
        for l in range(lins_w_ref.shape[0]):
            w = lins_w_ref[l]                                 # (Hp, Hp) [in,out]
            b = lins_b_ref[l]                                 # (1, Hp) f32
            z = jnp.dot(h.astype(jnp.bfloat16), w,
                        preferred_element_type=jnp.float32) + b
            h = z * jax.nn.sigmoid(z)                         # swish, f32 VPU/EUP
        out_ref[...] = jnp.dot(h.astype(jnp.bfloat16), w_out_ref[...],
                               preferred_element_type=jnp.float32)


def output_block(rbf, x, idx, w_rbf, lins_w, lins_b, w_out, *, num_nodes,
                 edge_tile=512, node_tile=256):
    """rbf:(E,R) x:(E,H) idx:(E,) w_rbf:(H,R) lins_w:(L,H,H) lins_b:(L,H)
    w_out:(O,H). Returns (num_nodes, O) float32."""
    E, R = rbf.shape
    H = x.shape[1]
    L = lins_w.shape[0]
    O = w_out.shape[0]
    LANE = 128
    bf16 = jnp.bfloat16

    R_p = _round_up(R, LANE)
    H_p = _round_up(H, LANE)
    O_p = _round_up(O, LANE)

    tE = max(LANE, min(_round_up(edge_tile, LANE), _round_up(E, LANE)))
    E_p = _round_up(E, tE)
    tN = max(8, min(_round_up(node_tile, 8), _round_up(num_nodes, 8)))
    N_p = _round_up(num_nodes, tN)
    nE = E_p // tE
    nN = N_p // tN

    # Pad + cast edge arrays.  Padded edges have rbf = x = 0 so they contribute
    # exactly zero regardless of their (zero) target index.
    rbf_p = jnp.zeros((E_p, R_p), bf16).at[:E, :R].set(rbf.astype(bf16))
    x_p = jnp.zeros((E_p, H_p), bf16).at[:E, :H].set(x.astype(bf16))
    idx_p = jnp.zeros((1, E_p), jnp.int32).at[0, :E].set(idx.astype(jnp.int32))

    # Pre-transposed ([in, out]) zero-padded weights -> no in-kernel transpose.
    w_rbf_t = jnp.zeros((R_p, H_p), bf16).at[:R, :H].set(w_rbf.T.astype(bf16))
    lins_w_t = jnp.zeros((L, H_p, H_p), bf16).at[:, :H, :H].set(
        jnp.transpose(lins_w, (0, 2, 1)).astype(bf16))
    lins_b_p = jnp.zeros((L, 1, H_p), jnp.float32).at[:, 0, :H].set(
        lins_b.astype(jnp.float32))
    w_out_t = jnp.zeros((H_p, O_p), bf16).at[:H, :O].set(w_out.T.astype(bf16))

    flops = int(2 * E * R * H + E * H + 2 * num_nodes * E * H
                + L * (2 * num_nodes * H * H + 3 * num_nodes * H)
                + 2 * num_nodes * H * O)
    transcendentals = int(L * num_nodes * H)
    bytes_accessed = int(2 * (E_p * R_p + E_p * H_p + R_p * H_p
                              + L * H_p * H_p + H_p * O_p)
                         + 4 * (E_p + L * H_p + N_p * O_p))

    grid_spec = pltpu.PrefetchScalarGridSpec(
        num_scalar_prefetch=0,
        grid=(nN, nE),
        in_specs=[
            pl.BlockSpec((tE, R_p), lambda n, e: (e, 0)),      # rbf tile
            pl.BlockSpec((tE, H_p), lambda n, e: (e, 0)),      # x tile
            pl.BlockSpec((1, tE), lambda n, e: (0, e)),        # idx tile
            pl.BlockSpec((R_p, H_p), lambda n, e: (0, 0)),     # w_rbf (resident)
            pl.BlockSpec((L, H_p, H_p), lambda n, e: (0, 0, 0)),
            pl.BlockSpec((L, 1, H_p), lambda n, e: (0, 0, 0)),
            pl.BlockSpec((H_p, O_p), lambda n, e: (0, 0)),
        ],
        out_specs=pl.BlockSpec((tN, O_p), lambda n, e: (n, 0)),
        scratch_shapes=[pltpu.VMEM((tN, H_p), jnp.float32)],   # node accumulator
    )

    out_p = pl.pallas_call(
        output_block_kernel,
        out_shape=jax.ShapeDtypeStruct((N_p, O_p), jnp.float32),
        grid_spec=grid_spec,
        compiler_params=pltpu.CompilerParams(
            dimension_semantics=("parallel", "arbitrary")),
        cost_estimate=pl.CostEstimate(flops=flops,
                                      transcendentals=transcendentals,
                                      bytes_accessed=bytes_accessed),
    )(rbf_p, x_p, idx_p, w_rbf_t, lins_w_t, lins_b_p, w_out_t)

    return out_p[:num_nodes, :O]


def reference(rbf, x, idx, w_rbf, lins_w, lins_b, w_out, *, num_nodes):
    """Mirrors the kernel's bf16-operand / f32-accumulate math."""
    bf, f32 = jnp.bfloat16, jnp.float32
    y = jnp.dot(rbf.astype(bf), w_rbf.T.astype(bf), preferred_element_type=f32)
    y = (y * x.astype(bf)).astype(bf)
    h = jnp.zeros((num_nodes, y.shape[1]), f32).at[idx].add(y.astype(f32))
    for l in range(lins_w.shape[0]):
        z = jnp.dot(h.astype(bf), lins_w[l].T.astype(bf),
                    preferred_element_type=f32) + lins_b[l].astype(f32)
        h = z * jax.nn.sigmoid(z)
    return jnp.dot(h.astype(bf), w_out.T.astype(bf), preferred_element_type=f32)


if __name__ == "__main__":
    # Small DimeNet++-consistent shapes, sized to exercise multiple edge and
    # node tiles (grid = (3, 3)).
    E, N, R, H, O, L = 300, 20, 6, 32, 16, 3

    key = jax.random.PRNGKey(0)
    ks = jax.random.split(key, 8)
    rbf = jax.random.normal(ks[0], (E, R), jnp.float32)
    x = jax.random.normal(ks[1], (E, H), jnp.float32)
    idx = jax.random.randint(ks[2], (E,), 0, N, jnp.int32)

    # Deterministic stand-ins for glorot_orthogonal; the module zero-fills the
    # final `lin` (trivially-zero output), so use a random fill to exercise it.
    w_rbf = jax.random.normal(ks[3], (H, R), jnp.float32) * (2.0 / (H + R)) ** 0.5
    lins_w = jax.random.normal(ks[4], (L, H, H), jnp.float32) * (1.0 / H) ** 0.5
    lins_b = jax.random.normal(ks[5], (L, H), jnp.float32) * 0.1
    w_out = jax.random.normal(ks[6], (O, H), jnp.float32) * (2.0 / (O + H)) ** 0.5

    out = output_block(rbf, x, idx, w_rbf, lins_w, lins_b, w_out,
                       num_nodes=N, edge_tile=128, node_tile=8)
    out = jax.block_until_ready(out)

    ref = reference(rbf, x, idx, w_rbf, lins_w, lins_b, w_out, num_nodes=N)
    assert out.shape == (N, O)
    err = float(jnp.max(jnp.abs(out - ref)))
    assert jnp.allclose(out, ref, atol=2e-3, rtol=2e-3), f"max abs err={err}"

    print("KERNEL_OK")
</pallas_src>

<mosaic_0001>
module attributes {stable_mosaic.version = 11 : i64} {
  func.func @output_block_kernel(%arg0: i32, %arg1: i32, %arg2: memref<128x128xbf16, #tpu.memory_space<vmem>>, %arg3: memref<128x128xbf16, #tpu.memory_space<vmem>>, %arg4: memref<1x128xi32, #tpu.memory_space<vmem>>, %arg5: memref<128x128xbf16, #tpu.memory_space<vmem>>, %arg6: memref<3x128x128xbf16, #tpu.memory_space<vmem>>, %arg7: memref<3x1x128xf32, #tpu.memory_space<vmem>>, %arg8: memref<128x128xbf16, #tpu.memory_space<vmem>>, %arg9: memref<8x128xf32, #tpu.memory_space<vmem>>, %arg10: memref<8x128xf32, #tpu.memory_space<vmem>>) attributes {dimension_semantics = [#tpu.dimension_semantics<parallel>, #tpu.dimension_semantics<arbitrary>], iteration_bounds = array<i64: 3, 3>, scalar_prefetch = 0 : i64, scratch_operands = 1 : i64, tpu.core_type = #tpu.core_type<tc>, window_params = [{transform_indices = @transform_0, window_bounds = array<i64: 128, 128>}, {transform_indices = @transform_1, window_bounds = array<i64: 128, 128>}, {transform_indices = @transform_2, window_bounds = array<i64: 1, 128>}, {pipeline_mode = #tpu.pipeline_mode<synchronous>, transform_indices = @transform_3, window_bounds = array<i64: 128, 128>}, {pipeline_mode = #tpu.pipeline_mode<synchronous>, transform_indices = @transform_4, window_bounds = array<i64: 3, 128, 128>}, {pipeline_mode = #tpu.pipeline_mode<synchronous>, transform_indices = @transform_5, window_bounds = array<i64: 3, 1, 128>}, {pipeline_mode = #tpu.pipeline_mode<synchronous>, transform_indices = @transform_6, window_bounds = array<i64: 128, 128>}, {transform_indices = @transform_7, window_bounds = array<i64: 8, 128>}]} {
    %c0_i32 = arith.constant 0 : i32
    %0 = arith.cmpi eq, %arg1, %c0_i32 : i32
    %1 = arith.extui %0 : i1 to i32
    %c0_i32_0 = arith.constant 0 : i32
    %2 = arith.cmpi ne, %1, %c0_i32_0 : i32
    scf.if %2 {
      %cst_14 = arith.constant 0.000000e+00 : f32
      %27 = vector.broadcast %cst_14 : f32 to vector<8x128xf32>
      %c0_15 = arith.constant 0 : index
      %c0_16 = arith.constant 0 : index
      %28 = vector.load %arg10[%c0_15, %c0_16] : memref<8x128xf32, #tpu.memory_space<vmem>>, vector<8x128xf32>
      tpu.vector_store %arg10[%c0_15, %c0_16], %27 {strides = array<i32>} : memref<8x128xf32, #tpu.memory_space<vmem>>, vector<8x128xf32>,
    } else {
    }
    %c0 = arith.constant 0 : index
    %c0_1 = arith.constant 0 : index
    %3 = vector.load %arg2[%c0, %c0_1] : memref<128x128xbf16, #tpu.memory_space<vmem>>, vector<128x128xbf16>
    %c0_2 = arith.constant 0 : index
    %c0_3 = arith.constant 0 : index
    %4 = vector.load %arg5[%c0_2, %c0_3] : memref<128x128xbf16, #tpu.memory_space<vmem>>, vector<128x128xbf16>
    %cst = arith.constant dense<0.000000e+00> : vector<128x128xf32>
    %5 = tpu.matmul %3, %4, %cst {dimension_numbers = #tpu.dot_dimension_numbers<[1], [0], [0], [1], [0, 0, 1, 1], [], []>} : vector<128x128xbf16>, vector<128x128xbf16>, vector<128x128xf32> -> vector<128x128xf32>
    %c0_4 = arith.constant 0 : index
    %c0_5 = arith.constant 0 : index
    %6 = vector.load %arg3[%c0_4, %c0_5] : memref<128x128xbf16, #tpu.memory_space<vmem>>, vector<128x128xbf16>
    %7 = arith.extf %6 : vector<128x128xbf16> to vector<128x128xf32>
    %8 = arith.mulf %5, %7 : vector<128x128xf32>
    %9 = arith.truncf %8 : vector<128x128xf32> to vector<128x128xbf16>
    %10 = tpu.iota {dimensions = array<i32: 0>} : vector<8x128xi32>
    %c8_i32 = arith.constant 8 : i32
    %11 = arith.muli %arg0, %c8_i32 : i32
    %12 = vector.broadcast %11 : i32 to vector<8x128xi32>
    %13 = arith.addi %10, %12 : vector<8x128xi32>
    %c0_6 = arith.constant 0 : index
    %c0_7 = arith.constant 0 : index
    %14 = vector.load %arg4[%c0_6, %c0_7] : memref<1x128xi32, #tpu.memory_space<vmem>>, vector<1x128xi32>
    %15 = vector.broadcast %14 : vector<1x128xi32> to vector<8x128xi32>
    %16 = arith.cmpi eq, %13, %15 : vector<8x128xi32>
    %17 = arith.extui %16 : vector<8x128xi1> to vector<8x128xi32>
    %18 = arith.sitofp %17 : vector<8x128xi32> to vector<8x128xf32>
    %19 = arith.truncf %18 : vector<8x128xf32> to vector<8x128xbf16>
    %c0_8 = arith.constant 0 : index
    %c0_9 = arith.constant 0 : index
    %20 = vector.load %arg10[%c0_8, %c0_9] : memref<8x128xf32, #tpu.memory_space<vmem>>, vector<8x128xf32>
    %cst_10 = arith.constant dense<0.000000e+00> : vector<8x128xf32>
    %21 = tpu.matmul %19, %9, %cst_10 {dimension_numbers = #tpu.dot_dimension_numbers<[1], [0], [0], [1], [0, 0, 1, 1], [], []>} : vector<8x128xbf16>, vector<128x128xbf16>, vector<8x128xf32> -> vector<8x128xf32>
    %22 = arith.addf %20, %21 : vector<8x128xf32>
    %c0_11 = arith.constant 0 : index
    %c0_12 = arith.constant 0 : index
    %23 = vector.load %arg10[%c0_11, %c0_12] : memref<8x128xf32, #tpu.memory_space<vmem>>, vector<8x128xf32>
    tpu.vector_store %arg10[%c0_11, %c0_12], %22 {strides = array<i32>} : memref<8x128xf32, #tpu.memory_space<vmem>>, vector<8x128xf32>,
    %c2_i32 = arith.constant 2 : i32
    %24 = arith.cmpi eq, %arg1, %c2_i32 : i32
    %25 = arith.extui %24 : i1 to i32
    %c0_i32_13 = arith.constant 0 : i32
    %26 = arith.cmpi ne, %25, %c0_i32_13 : i32
    scf.if %26 {
      %c0_14 = arith.constant 0 : index
      %c0_15 = arith.constant 0 : index
      %27 = vector.load %arg10[%c0_14, %c0_15] : memref<8x128xf32, #tpu.memory_space<vmem>>, vector<8x128xf32>
      %c0_16 = arith.constant 0 : index
      %c0_17 = arith.constant 0 : index
      %c0_18 = arith.constant 0 : index
      %28 = vector.load %arg6[%c0_16, %c0_17, %c0_18] : memref<3x128x128xbf16, #tpu.memory_space<vmem>>, vector<1x128x128xbf16>
      %29 = vector.shape_cast %28 : vector<1x128x128xbf16> to vector<128x128xbf16>
      %c0_19 = arith.constant 0 : index
      %c0_20 = arith.constant 0 : index
      %c0_21 = arith.constant 0 : index
      %30 = vector.load %arg7[%c0_19, %c0_20, %c0_21] : memref<3x1x128xf32, #tpu.memory_space<vmem>>, vector<1x1x128xf32>
      %31 = vector.shape_cast %30 : vector<1x1x128xf32> to vector<1x128xf32>
      %32 = arith.truncf %27 : vector<8x128xf32> to vector<8x128xbf16>
      %cst_22 = arith.constant dense<0.000000e+00> : vector<8x128xf32>
      %33 = tpu.matmul %32, %29, %cst_22 {dimension_numbers = #tpu.dot_dimension_numbers<[1], [0], [0], [1], [0, 0, 1, 1], [], []>} : vector<8x128xbf16>, vector<128x128xbf16>, vector<8x128xf32> -> vector<8x128xf32>
      %34 = vector.broadcast %31 : vector<1x128xf32> to vector<8x128xf32>
      %35 = arith.addf %33, %34 : vector<8x128xf32>
      %36 = arith.negf %35 : vector<8x128xf32>
      %37 = math.exp %36 : vector<8x128xf32>
      %cst_23 = arith.constant 1.000000e+00 : f32
      %38 = vector.broadcast %cst_23 : f32 to vector<8x128xf32>
      %39 = arith.addf %38, %37 : vector<8x128xf32>
      %40 = arith.divf %38, %39 : vector<8x128xf32>
      %41 = arith.mulf %35, %40 : vector<8x128xf32>
      %c1 = arith.constant 1 : index
      %c0_24 = arith.constant 0 : index
      %c0_25 = arith.constant 0 : index
      %42 = vector.load %arg6[%c1, %c0_24, %c0_25] : memref<3x128x128xbf16, #tpu.memory_space<vmem>>, vector<1x128x128xbf16>
      %43 = vector.shape_cast %42 : vector<1x128x128xbf16> to vector<128x128xbf16>
      %c1_26 = arith.constant 1 : index
      %c0_27 = arith.constant 0 : index
      %c0_28 = arith.constant 0 : index
      %44 = vector.load %arg7[%c1_26, %c0_27, %c0_28] : memref<3x1x128xf32, #tpu.memory_space<vmem>>, vector<1x1x128xf32>
      %45 = vector.shape_cast %44 : vector<1x1x128xf32> to vector<1x128xf32>
      %46 = arith.truncf %41 : vector<8x128xf32> to vector<8x128xbf16>
      %cst_29 = arith.constant dense<0.000000e+00> : vector<8x128xf32>
      %47 = tpu.matmul %46, %43, %cst_29 {dimension_numbers = #tpu.dot_dimension_numbers<[1], [0], [0], [1], [0, 0, 1, 1], [], []>} : vector<8x128xbf16>, vector<128x128xbf16>, vector<8x128xf32> -> vector<8x128xf32>
      %48 = vector.broadcast %45 : vector<1x128xf32> to vector<8x128xf32>
      %49 = arith.addf %47, %48 : vector<8x128xf32>
      %50 = arith.negf %49 : vector<8x128xf32>
      %51 = math.exp %50 : vector<8x128xf32>
      %cst_30 = arith.constant 1.000000e+00 : f32
      %52 = vector.broadcast %cst_30 : f32 to vector<8x128xf32>
      %53 = arith.addf %52, %51 : vector<8x128xf32>
      %54 = arith.divf %52, %53 : vector<8x128xf32>
      %55 = arith.mulf %49, %54 : vector<8x128xf32>
      %c2 = arith.constant 2 : index
      %c0_31 = arith.constant 0 : index
      %c0_32 = arith.constant 0 : index
      %56 = vector.load %arg6[%c2, %c0_31, %c0_32] : memref<3x128x128xbf16, #tpu.memory_space<vmem>>, vector<1x128x128xbf16>
      %57 = vector.shape_cast %56 : vector<1x128x128xbf16> to vector<128x128xbf16>
      %c2_33 = arith.constant 2 : index
      %c0_34 = arith.constant 0 : index
      %c0_35 = arith.constant 0 : index
      %58 = vector.load %arg7[%c2_33, %c0_34, %c0_35] : memref<3x1x128xf32, #tpu.memory_space<vmem>>, vector<1x1x128xf32>
      %59 = vector.shape_cast %58 : vector<1x1x128xf32> to vector<1x128xf32>
      %60 = arith.truncf %55 : vector<8x128xf32> to vector<8x128xbf16>
      %cst_36 = arith.constant dense<0.000000e+00> : vector<8x128xf32>
      %61 = tpu.matmul %60, %57, %cst_36 {dimension_numbers = #tpu.dot_dimension_numbers<[1], [0], [0], [1], [0, 0, 1, 1], [], []>} : vector<8x128xbf16>, vector<128x128xbf16>, vector<8x128xf32> -> vector<8x128xf32>
      %62 = vector.broadcast %59 : vector<1x128xf32> to vector<8x128xf32>
      %63 = arith.addf %61, %62 : vector<8x128xf32>
      %64 = arith.negf %63 : vector<8x128xf32>
      %65 = math.exp %64 : vector<8x128xf32>
      %cst_37 = arith.constant 1.000000e+00 : f32
      %66 = vector.broadcast %cst_37 : f32 to vector<8x128xf32>
      %67 = arith.addf %66, %65 : vector<8x128xf32>
      %68 = arith.divf %66, %67 : vector<8x128xf32>
      %69 = arith.mulf %63, %68 : vector<8x128xf32>
      %70 = arith.truncf %69 : vector<8x128xf32> to vector<8x128xbf16>
      %c0_38 = arith.constant 0 : index
      %c0_39 = arith.constant 0 : index
      %71 = vector.load %arg8[%c0_38, %c0_39] : memref<128x128xbf16, #tpu.memory_space<vmem>>, vector<128x128xbf16>
      %cst_40 = arith.constant dense<0.000000e+00> : vector<8x128xf32>
      %72 = tpu.matmul %70, %71, %cst_40 {dimension_numbers = #tpu.dot_dimension_numbers<[1], [0], [0], [1], [0, 0, 1, 1], [], []>} : vector<8x128xbf16>, vector<128x128xbf16>, vector<8x128xf32> -> vector<8x128xf32>
      %c0_41 = arith.constant 0 : index
      %c0_42 = arith.constant 0 : index
      %73 = vector.load %arg9[%c0_41, %c0_42] : memref<8x128xf32, #tpu.memory_space<vmem>>, vector<8x128xf32>
      tpu.vector_store %arg9[%c0_41, %c0_42], %72 {strides = array<i32>} : memref<8x128xf32, #tpu.memory_space<vmem>>, vector<8x128xf32>,
    } else {
    }
    return
  }
  func.func @transform_0(%arg0: i32, %arg1: i32) -> (i32, i32) {
    %c0_i32 = arith.constant 0 : i32
    %c0_i32_0 = arith.constant 0 : i32
    return %arg1, %c0_i32 : i32, i32
  }
  func.func @transform_1(%arg0: i32, %arg1: i32) -> (i32, i32) {
    %c0_i32 = arith.constant 0 : i32
    %c0_i32_0 = arith.constant 0 : i32
    return %arg1, %c0_i32 : i32, i32
  }
  func.func @transform_2(%arg0: i32, %arg1: i32) -> (i32, i32) {
    %c0_i32 = arith.constant 0 : i32
    %c0_i32_0 = arith.constant 0 : i32
    return %c0_i32, %arg1 : i32, i32
  }
  func.func @transform_3(%arg0: i32, %arg1: i32) -> (i32, i32) {
    %c0_i32 = arith.constant 0 : i32
    %c0_i32_0 = arith.constant 0 : i32
    %c0_i32_1 = arith.constant 0 : i32
    return %c0_i32, %c0_i32_0 : i32, i32
  }
  func.func @transform_4(%arg0: i32, %arg1: i32) -> (i32, i32, i32) {
    %c0_i32 = arith.constant 0 : i32
    %c0_i32_0 = arith.constant 0 : i32
    %c0_i32_1 = arith.constant 0 : i32
    %c0_i32_2 = arith.constant 0 : i32
    return %c0_i32, %c0_i32_0, %c0_i32_1 : i32, i32, i32
  }
  func.func @transform_5(%arg0: i32, %arg1: i32) -> (i32, i32, i32) {
    %c0_i32 = arith.constant 0 : i32
    %c0_i32_0 = arith.constant 0 : i32
    %c0_i32_1 = arith.constant 0 : i32
    %c0_i32_2 = arith.constant 0 : i32
    return %c0_i32, %c0_i32_0, %c0_i32_1 : i32, i32, i32
  }
  func.func @transform_6(%arg0: i32, %arg1: i32) -> (i32, i32) {
    %c0_i32 = arith.constant 0 : i32
    %c0_i32_0 = arith.constant 0 : i32
    %c0_i32_1 = arith.constant 0 : i32
    return %c0_i32, %c0_i32_0 : i32, i32
  }
  func.func @transform_7(%arg0: i32, %arg1: i32) -> (i32, i32) {
    %c0_i32 = arith.constant 0 : i32
    %c0_i32_0 = arith.constant 0 : i32
    return %arg0, %c0_i32 : i32, i32
  }
}

</mosaic_0001>

<bundles_post_ra>
// kernel: tpu_custom_call.1
= control target key start
LH: loop header
LB: loop body
LE: loop exit
PB: predicated region body
PF: predicated region fallthrough
CT: control target
= control target key end

     0   :  { %s2426_s0 = inlined_call_operand.hbm [shape: bf16[384,128], index: 0, kind: input, shape index: {}]   ;;  %s2427_s1 = inlined_call_operand.hbm [shape: bf16[384,128], index: 1, kind: input, shape index: {}]   ;;  %s2428_s2 = inlined_call_operand.hbm [shape: s32[1,384], index: 2, kind: input, shape index: {}]   ;;  %s2429_s3 = inlined_call_operand.hbm [shape: bf16[128,128], index: 3, kind: input, shape index: {}]   ;;  %s2430_s4 = inlined_call_operand.hbm [shape: bf16[3,128,128], index: 4, kind: input, shape index: {}]   ;;  %s2431_s5 = inlined_call_operand.vmem [shape: f32[3,1,128], index: 5, kind: input, shape index: {}]   ;;  %s2432_s6 = inlined_call_operand.hbm [shape: bf16[128,128], index: 6, kind: input, shape index: {}]   ;;  %s2433_s7 = inlined_call_operand.hbm [shape: f32[24,128], index: 7, kind: output, shape index: {}]  }
   0x1   :  { %2451 = sst [smem:[#allocation31_spill]] %s2427_s1 }
   0x2   :  { %2452 = sst [smem:[#allocation32_spill]] %s2429_s3 }
   0x3   :  { %2453 = sst [smem:[#allocation33_spill]] %s2431_s5 }
   0x4   :  { %2454 = sst [smem:[#allocation34_spill]] %s2433_s7 }
   0x5   :  { %12 = vsyncpa [#allocation4], 0 }
   0x6   :  { %14 = vsyncpa [#allocation4 + $0x1], 0 }
   0x7   :  { %15 = vsyncpa [#allocation7], 0 }
   0x8   :  { %17 = vsyncpa [#allocation7 + $0x1], 0 }
   0x9   :  { %18 = vsyncpa [#allocation10], 0 }
   0xa   :  { %19 = vsyncpa [#allocation13], 0 }
   0xb   :  { %20 = vsyncpa [#allocation5], 0 }
   0xc   :  { %22 = vsyncpa [#allocation5 + $0x1], 0  ;;  %s2119_s24 = smov 0   ;;  %s2121_s25 = smov 0  }
   0xd   :  { %s2123_s26 = smov 0   ;;  %s2125_s27 = smov 0  }
   0xe   :  { %s2127_s28 = smov 0   ;;  %s2129_s29 = smov 0  }
   0xf   :  { %s2131_s30 = smov 0   ;;  %s2133_s8 = smov 0  }
  0x10   :  { %s2135_s9 = smov 0   ;;  %s2137_s10 = smov 0  }
  0x11   :  { %s2139_s11 = smov 0  }
  0x12 LB: > { %2455 = sst [smem:[#allocation20_spill]] %s2030_s24  ;;  %s2173_s12 = sadd.s32 4294967295, %s2070_s11   ;;  %s2070_s11 = sphi %s2139_s11, %s28_s11   ;;  %s2066_s10 = sphi %s2137_s10, %s2491_s10   ;;  %s2062_s9 = sphi %s2135_s9, %s2497_s9   ;;  %s2058_s8 = sphi %s2133_s8, %s2489_s8   ;;  %s2054_s30 = sphi %s2131_s30, %s2496_s30   ;;  %s2050_s29 = sphi %s2129_s29, %s2488_s29   ;;  %s2046_s28 = sphi %s2127_s28, %s2495_s28   ;;  %s2042_s27 = sphi %s2125_s27, %s2494_s27   ;;  %s2038_s26 = sphi %s2123_s26, %s2486_s26   ;;  %s2034_s25 = sphi %s2121_s25, %s2493_s25   ;;  %s2030_s24 = sphi %s2119_s24, %s2492_s24  }
  0x13   : > { %2456 = sst [smem:[#allocation21_spill]] %s2038_s26  ;;  %s1262_s13 = sadd.s32 4294967294, %s2070_s11  }
  0x14   : > { %2457 = sst [smem:[#allocation22_spill]] %s2050_s29  ;;  %p60_p0 = scmp.ne.s32.totalorder %s2046_s28, %s2042_s27 }
  0x15   : > { %2458 = sst [smem:[#allocation23_spill]] %s2058_s8  ;;  %p61_p1 = scmp.eq.s32.totalorder %s2173_s12, 0 }
  0x16   : > { %2459 = sst [smem:[#allocation24_spill]] %s2066_s10  ;;  %p219_p2 = scmp.ne.s32.totalorder %s2038_s26, %s2034_s25 }
  0x17   : > { %p2183_p3 = por %p61_p1, %p60_p0  ;;  %p220_p4 = scmp.eq.s32.totalorder %s2173_s12, 8 }
  0x18   : > { %p225_p5 = scmp.ne.s32.totalorder %s2034_s25, %s2030_s24  ;;  %p226_p6 = scmp.eq.s32.totalorder %s1262_s13, 8 }
  0x19   : > { %p2190_p7 = por %p220_p4, %p219_p2  ;;  %p1263_p8 = scmp.ge.s32.totalorder %s2070_s11, 1 }
  0x1a   : > { %p2195_p9 = por %p226_p6, %p225_p5  ;;  %p233_p10 = scmp.lt.s32.totalorder %s2070_s11, 10 }
  0x1b   : > { %s2461_s16 = scalar_select %p2190_p7, 1, 0 }
  0x1c   : > { %s2463_s17 = scalar_select %p2195_p9, 1, 0 }
  0x1d   : > { %2462 = sst [smem:[#allocation25_spill]] %s2461_s16  ;;  %p2203_p11 = pnand %p1263_p8, %p233_p10 }
  0x1e   : > { %2464 = sst [smem:[#allocation26_spill]] %s2463_s17  ;;  %s2072_s22 = smov [#allocation9]  }
  0x1f   : > { %s2465_s3 = sld [smem:[#allocation32_spill]]  ;;  %p1613_p12 = pneg %p2203_p11 }
  0x20   : > { %s246_s23 = sshll.u32 %s2072_s22, 4  ;;  %s2434_s13 = smov 64   ;;  %s247_s23 = int_to_ptr.vmem [resolvable:$true] %s246_s23 }
  0x21   : > { %p2211_p13 = pnand %p1613_p12, %p61_p1  ;;  %s2436_s18 = smov 4  }
  0x22   : > { %s37_s19 = sadd.s32 1, %s2062_s9  ;;  %s40_s22 = sadd.s32 1, %s2066_s10 }
  0x23   : > { %p38_p0 = scmp.ge.s32.totalorder %s37_s19, 3  ;;  %s47_s14 = sadd.s32 1, %s2050_s29 }
  0x24   : > { %p54_p2 = scmp.ne.s32.totalorder %s2050_s29, %s2046_s28  ;;  %p55_p4 = scmp.eq.s32.totalorder %s2070_s11, 0 }
  0x25   : > { %s244_s20 = sshll.u32 %s2465_s3, 4  ;;  %s2499_s19 = smov (%p38_p0, %s37_s19), 0  ;;  %s245_s20 = int_to_ptr.hbm [resolvable:$true] %s244_s20 }
  0x26   : > { %1616 = dma.hbm_to_vmem [thread:$0]  (!%p2211_p13), %s245_s20, 1024, %s247_s23, [#allocation10], %s2434_s13, %s2434_s13, %s2436_s18  }
  0x27   : > { %2468 = sst [smem:[#allocation27_spill]] %s2499_s19  ;;  %s2501_s22 = smov (!%p38_p0, %s40_s22), %s2066_s10 }
  0x28   : > { %s44_s3 = ssub.s32 %s2062_s9, %s2499_s19  ;;  %p42_p5 = scmp.ge.s32.totalorder %s2501_s22, 3 }
  0x29   : > { %p45_p6 = scmp.eq.s32.totalorder %s44_s3, 0  ;;  %p56_p8 = por %p55_p4, %p54_p2 }
  0x2a   : > { %p1640_p10 = scmp.lt.s32.totalorder %s2070_s11, 9  ;;  %s2503_s22 = smov (%p42_p5, %s2501_s22), 0 }
  0x2b   : > { %2469 = sst [smem:[#allocation28_spill]] %s2503_s22  ;;  %s206_s23 = ssub.s32 %s2066_s10, %s2503_s22 }
  0x2c   : > { %s2235_s20 = scalar_select %p45_p6, %s2050_s29, %s47_s14  }
  0x2d   : > { %s2240_s13 = sand.u32 1, %s2050_s29   ;;  %p207_p12 = scmp.eq.s32.totalorder %s206_s23, 0 }
  0x2e   : > { %2470 = sst [smem:[#allocation29_spill]] %s2235_s20  ;;  %s2450_s18 = sshll.u32 %s2240_s13, 6 }
  0x2f   : > { %s1488_s17 = sshll.u32 %s2062_s9, 6  ;;  %p2244_p0 = pnand %p1640_p10, %p56_p8 }
  0x30   : > { %s2472_s3 = sadd.s32 1, %s2038_s26  ;;  %s313_s16 = sand.u32 1, %s2070_s11  }
  0x31   : > { %s2251_s24 = scalar_select %p207_p12, %s2038_s26, %s2472_s3  }
  0x32   : > { %s2474_s1 = sld [smem:[#allocation31_spill]]  ;;  %s317_s10 = scalar_lea.vmem [#allocation6], %s2450_s18 }
  0x33   : > { %2473 = sst [smem:[#allocation30_spill]] %s2251_s24  ;;  %s325_s20 = sshll.u32 %s317_s10, 4  ;;  %s326_s20 = int_to_ptr.vmem [resolvable:$true] %s325_s20 }
  0x34   : > { %s258_s8 = sshll.u32 %s2430_s4, 4  ;;  %s314_s3 = scalar_lea.sflag [#allocation7], %s313_s16  ;;  %s259_s8 = int_to_ptr.hbm [resolvable:$true] %s258_s8 }
  0x35   : > { %s2475_s24 = smov 4   ;;  %s2476_s26 = smov 64  }
  0x36   : > { %s2075_s7 = smov [#allocation11]   ;;  %s275_s18 = sshll.u32 %s2432_s6, 4  ;;  %s276_s18 = int_to_ptr.hbm [resolvable:$true] %s275_s18 }
  0x37   : > { %s260_s14 = sshll.u32 %s2075_s7, 4  ;;  %s2076_s5 = smov [#allocation12]   ;;  %s261_s14 = int_to_ptr.vmem [resolvable:$true] %s260_s14 }
  0x38   : > { %s322_s22 = scalar_lea.hbm %s2474_s1, %s1488_s17  ;;  %s277_s29 = sshll.u32 %s2076_s5, 4  ;;  %s278_s29 = int_to_ptr.vmem [resolvable:$true] %s277_s29 }
  0x39   : > { %s323_s23 = sshll.u32 %s322_s22, 4  ;;  %s2477_s10 = sshll.u32 %s2240_s13, 6  ;;  %s324_s23 = int_to_ptr.hbm [resolvable:$true] %s323_s23 }
  0x3a   : > { %1629 = dma.hbm_to_vmem [thread:$0]  (!%p2244_p0), %s324_s23, 1024, %s326_s20, %s314_s3, %s2476_s26, %s2476_s26, %s2475_s24  }
  0x3b   : > { %1619 = dma.hbm_to_vmem [thread:$0]  (!%p2211_p13), %s259_s8, 3072, %s261_s14, [#allocation10], %s2476_s26, %s2476_s26, %s2475_s24  }
  0x3c   : > { %s300_s23 = scalar_lea.hbm %s2426_s0, %s1488_s17  ;;  %s295_s22 = scalar_lea.vmem [#allocation3], %s2477_s10 }
  0x3d   : > { %1622 = dma.hbm_to_vmem [thread:$0]  (!%p2211_p13), %s276_s18, 1024, %s278_s29, [#allocation13], %s2476_s26, %s2476_s26, %s2475_s24  }
  0x3e   : > { %s301_s7 = sshll.u32 %s300_s23, 4  ;;  %s303_s1 = sshll.u32 %s295_s22, 4  ;;  %s302_s7 = int_to_ptr.hbm [resolvable:$true] %s301_s7  ;;  %s304_s1 = int_to_ptr.vmem [resolvable:$true] %s303_s1 }
  0x3f   : > { %s292_s8 = scalar_lea.sflag [#allocation4], %s2240_s13  ;;  %s341_s17 = scalar_lea.hbm %s2428_s2, %s2062_s9 }
  0x40   : > { %1626 = dma.hbm_to_vmem [thread:$0]  (!%p2244_p0), %s302_s7, 1024, %s304_s1, %s292_s8, %s2476_s26, %s2476_s26, %s2475_s24  }
  0x41   : > { %s343_s27 = sshll.u32 %s341_s17, 4  ;;  %s338_s16 = scalar_lea.vmem [#allocation8], %s2240_s13  ;;  %s344_s27 = int_to_ptr.hbm [resolvable:$true] %s343_s27 }
  0x42   : > { %s345_s20 = sshll.u32 %s338_s16, 4  ;;  %354 = sbr.rel (%p2203_p11) target bundleno = 1139 (0x473), region = 48  ;;  %s346_s20 = int_to_ptr.vmem [resolvable:$true] %s345_s20 }
  0x43   : > { %1632 = dma.hbm_to_vmem [thread:$0]  (!%p2244_p0), %s344_s27, 16, %s346_s20, %s314_s3  }
  0x44   : > { %s2301_s18 = sand.u32 (!%p2203_p11), 1, %s2046_s28  }
  0x45   : > { %s1275_s1 = sshll.u32 (!%p2203_p11), %s2301_s18, 6  ;;  %s357_s24 = scalar_lea.sflag (!%p2203_p11), [#allocation4], %s2301_s18 }
  0x46   : > { %s2305_s26 = scalar_lea.vmem (!%p2203_p11), [#allocation3], %s1275_s1 }
  0x47   : > { %2009 = dma.done.wait (%p2183_p3), %s357_s24, 1024  }
  0x48   : > { %2011 = vsyncadd (%p2183_p3), %s357_s24, 4294966272  ;;  %s366_s13 = sand.u32 1, %s2173_s12   ;;  %s2312_s19 = scalar_lea.vmem [#allocation6], %s1275_s1 }
  0x49   : > { %s367_s21 = scalar_lea.sflag [#allocation7], %s366_s13 }
  0x4a   : > { %2013 = dma.done.wait (%p2183_p3), %s367_s21, 1040  }
  0x4b   : > { %2015 = vsyncadd (%p2183_p3), %s367_s21, 4294966256  ;;  %s379_s3 = scalar_lea.vmem [#allocation8], %s2301_s18 }
  0x4c   : > { %2017 = dma.done.wait (%p61_p1), [#allocation10], 4096  }
  0x4d   : > { %2019 = vsyncadd (%p61_p1), [#allocation10], 4294963200 }
  0x4e   : > { %2021 = dma.done.wait (%p61_p1), [#allocation13], 1024  }
  0x4f   : > { %2023 = vsyncadd (%p61_p1), [#allocation13], 4294966272  ;;  %s432_s29 = sand.u32 1, %s2034_s25   ;;  %p1281_p3 = scmp.ne.s32.totalorder %s2054_s30, 0 }
  0x50   : > { %s2330_s15 = sshll.u32 %s432_s29, 3 }
  0x51   : > { %s434_s23 = scalar_lea.vmem [#allocation14], %s2330_s15  ;;  %440 = sbr.rel (%p1281_p3) target bundleno = 88 (0x58), region = 76 }
  0x56   : > { %v2077_v0 = vmov 0.0  }
  0x57   : > { %441 = vst [vmem:[#allocation2] sm:$0xff] %v2077_v0 }
  0x58 PF: > { %v1505_v1 = vld [vmem:[#allocation9 + $0x38] sm:$0xff]  ;;  %v1504_v2 = vld [vmem:[#allocation9 + $0x30] sm:$0xff]  ;;  %v1503_v3 = vld [vmem:[#allocation9 + $0x28] sm:$0xff]  ;;  %s2478_s12 = sld [smem:[#allocation23_spill]]  ;;  %p1350_p1 = scmp.ne.s32.totalorder %s2054_s30, 2 }
  0x59   : > { %1578 = vmatpush.bf16.msra.mxu3 %v1505_v1  ;;  %1577 = vmatpush.bf16.msra.mxu2 %v1505_v1  ;;  %v1502_v4 = vld [vmem:[#allocation9 + $0x20] sm:$0xff]  ;;  %v1501_v5 = vld [vmem:[#allocation9 + $0x18] sm:$0xff]  ;;  %v1500_v6 = vld [vmem:[#allocation9 + $0x10] sm:$0xff]  ;;  %s2479_s22 = sld [smem:[#allocation33_spill]] (!%p1350_p1) }
  0x5a   : > { %570 = vmatpush.bf16.msra.mxu0 %v1505_v1  ;;  %v1499_v7 = vld [vmem:[#allocation9 + $0x8] sm:$0xff]  ;;  %v1498_v8 = vld [vmem:[#allocation9] sm:$0xff]  ;;  %v1493_v13 = vld [vmem:[%s2305_s26 + $0x18] sm:$0xff] }
  0x5b   : > { %v1495_v9 = vld [vmem:[%s2305_s26 + $0x28] sm:$0xff]  ;;  %v1492_v10 = vld [vmem:[%s2305_s26 + $0x10] sm:$0xff]  ;;  %v1490_v11 = vld [vmem:[%s2305_s26] sm:$0xff] }
  0x5c   : > { %v1496_v12 = vld [vmem:[%s2305_s26 + $0x30] sm:$0xff]  ;;  %v1491_v14 = vld [vmem:[%s2305_s26 + $0x8] sm:$0xff]  ;;  %v1497_v15 = vld [vmem:[%s2305_s26 + $0x38] sm:$0xff] }
  0x5d   : > { %1580 = vmatpush.bf16.msra.mxu3 %v1504_v2  ;;  %1579 = vmatpush.bf16.msra.mxu2 %v1504_v2  ;;  %v1494_v16 = vld [vmem:[%s2305_s26 + $0x20] sm:$0xff]  ;;  %v1576_v27 = vld [vmem:[%s2312_s19 + $0x38] sm:$0xff]   ;;  %v1575_v30 = vld [vmem:[%s2312_s19 + $0x30] sm:$0xff]  }
  0x5e   : > { %571 = vmatpush.bf16.msra.mxu0 %v1504_v2  ;;  %v1568_v28 = vunpack.c.l.bf16 %v1576_v27  ;;  %v1569_v29 = vunpack.c.h.bf16 %v1576_v27  ;;  %v1565_v32 = vunpack.c.h.bf16 %v1575_v30  ;;  %v1564_v35 = vunpack.c.l.bf16 %v1575_v30  ;;  %v1574_v38 = vld [vmem:[%s2312_s19 + $0x28] sm:$0xff]   ;;  %v1573_v42 = vld [vmem:[%s2312_s19 + $0x20] sm:$0xff]   ;;  %v1572_v46 = vld [vmem:[%s2312_s19 + $0x18] sm:$0xff]   ;;  %s1346_s7 = sshll.u32 %s2478_s12, 3 }
  0x5f   : > { %v1561_v39 = vunpack.c.h.bf16 %v1574_v38  ;;  %v1560_v43 = vunpack.c.l.bf16 %v1574_v38  ;;  %v1556_v47 = vunpack.c.l.bf16 %v1573_v42  ;;  %v1557_v48 = vunpack.c.h.bf16 %v1573_v42  ;;  %v1571_v54 = vld [vmem:[%s2312_s19 + $0x10] sm:$0xff]   ;;  %v1570_v0 = vld [vmem:[%s2312_s19 + $0x8] sm:$0xff]  }
  0x60   : > { %v1552_v52 = vunpack.c.l.bf16 %v1572_v46  ;;  %v1553_v55 = vunpack.c.h.bf16 %v1572_v46  ;;  %v1548_v59 = vunpack.c.l.bf16 %v1571_v54  ;;  %v1549_v60 = vunpack.c.h.bf16 %v1571_v54 }
  0x61   : > { %1582 = vmatpush.bf16.msra.mxu3 %v1503_v3  ;;  %1581 = vmatpush.bf16.msra.mxu2 %v1503_v3  ;;  %v675_v2 = vlaneseq }
  0x62   : > { %572 = vmatpush.bf16.msra.mxu0 %v1503_v3 }
  0x65   : > { %1584 = vmatpush.bf16.msra.mxu3 %v1502_v4  ;;  %1583 = vmatpush.bf16.msra.mxu2 %v1502_v4 }
  0x66   : > { %573 = vmatpush.bf16.msra.mxu0 %v1502_v4  ;;  %v1539_v4 = vld [vmem:[%s2312_s19] sm:$0xff]  }
  0x69   : > { %1586 = vmatpush.bf16.msra.mxu3 %v1501_v5  ;;  %1585 = vmatpush.bf16.msra.mxu2 %v1501_v5 }
  0x6a   : > { %574 = vmatpush.bf16.msra.mxu0 %v1501_v5  ;;  %v1544_v5 = vunpack.c.l.bf16 %v1570_v0 }
  0x6d   : > { %1588 = vmatpush.bf16.msra.mxu3 %v1500_v6  ;;  %1587 = vmatpush.bf16.msra.mxu2 %v1500_v6 }
  0x6e   : > { %575 = vmatpush.bf16.msra.mxu0 %v1500_v6  ;;  %v1545_v6 = vunpack.c.h.bf16 %v1570_v0 }
  0x71   : > { %1590 = vmatpush.bf16.msra.mxu3 %v1499_v7  ;;  %1589 = vmatpush.bf16.msra.mxu2 %v1499_v7 }
  0x72   : > { %576 = vmatpush.bf16.msra.mxu0 %v1499_v7 }
  0x75   : > { %1592 = vmatpush.bf16.msra.mxu3 %v1498_v8  ;;  %1591 = vmatpush.bf16.msra.mxu2 %v1498_v8 }
  0x76   : > { %577 = vmatpush.bf16.msra.mxu0 %v1498_v8 }
  0x78   : > { %603 = vmatmul.bf16.vlgmr.msra.gmra.mxu3 %v1495_v9  ;;  %588 = vmatmul.bf16.vlgmr.msra.gmra.mxu2 %v1492_v10  ;;  %v1540_v9 = vunpack.c.l.bf16 %v1539_v4  ;;  %v1541_v10 = vunpack.c.h.bf16 %v1539_v4 }
  0x79   : > { %578 = vmatmul.bf16.vlgmr.msra.gmra.mxu0 %v1490_v11  ;;  %v676_v11 = vshrl.u32 %v675_v2, 7 }
  0x88   : > { %608 = vmatmul.bf16.gmra.mxu3 %v1496_v12  ;;  %593 = vmatmul.bf16.gmra.mxu2 %v1493_v13 }
  0x89   : > { %583 = vmatmul.bf16.gmra.mxu0 %v1491_v14 }
  0x98   : > { %613 = vmatmul.bf16.gmra.mxu3 %v1497_v15  ;;  %598 = vmatmul.bf16.gmra.mxu2 %v1494_v16  ;;  %v678_v15 = vstv %s1346_s7 }
  0x99   : > { %v679_v16 = vadd.s32 %v678_v15, %v676_v11 }
  0xf6   : > { %v2342_v25 = vpop.f32.mrf.mxu0 }
  0xfb   : > { %v604_v17 = vpop.f32.mrf.mxu3  ;;  %v589_v18 = vpop.f32.mrf.mxu2 }
  0xfc   : > { %v661_v51 = vmul.f32 %v1560_v43, %v604_v17  ;;  %v655_v1 = vmul.f32 %v1548_v59, %v589_v18  ;;  %v1740_v17 = vld [vmem:[%s379_s3] ss:$0 sm:$0xff]  ;;  %v651_v18 = vmul.f32 %v1540_v9, %v2342_v25 }
  0xfd   : > { %vm682_vm0 = vcmp.eq.s32.totalorder %v679_v16, %v1740_v17 }
  0xfe   : > { %v581_v33 = vpop.f32.mrf.mxu0  ;;  %vm1348_vm1 = vmpackc.low %vm682_vm0, %vm682_vm0 }
 0x103   : > { %v606_v19 = vpop.f32.mrf.mxu3  ;;  %v591_v20 = vpop.f32.mrf.mxu2 }
 0x104   : > { %v662_v45 = vmul.f32 %v1561_v39, %v606_v19  ;;  %v656_v3 = vmul.f32 %v1549_v60, %v591_v20  ;;  %v652_v19 = vmul.f32 %v1541_v10, %v581_v33 }
 0x106   : > { %v584_v53 = vpop.f32.mrf.mxu0  ;;  %v672_v58 = vpack.c.bf16 %v662_v45, %v661_v51  ;;  %v669_v14 = vpack.c.bf16 %v656_v3, %v655_v1 }
 0x107   : > { %v653_v12 = vmul.f32 %v1544_v5, %v584_v53 }
 0x10b   : > { %v609_v21 = vpop.f32.mrf.mxu3  ;;  %v594_v22 = vpop.f32.mrf.mxu2 }
 0x10c   : > { %v663_v44 = vmul.f32 %v1564_v35, %v609_v21  ;;  %v657_v61 = vmul.f32 %v1552_v52, %v594_v22  ;;  %v667_v21 = vpack.c.bf16 %v652_v19, %v651_v18  ;;  %v2078_v22 = vmov 1.0|1.0  }
 0x10e   : > { %v586_v8 = vpop.f32.mrf.mxu0 }
 0x10f   : > { %v654_v13 = vmul.f32 %v1545_v6, %v586_v8 }
 0x111   : > { %v668_v20 = vpack.c.bf16 %v654_v13, %v653_v12 }
 0x113   : > { %v611_v23 = vpop.f32.mrf.mxu3  ;;  %v596_v24 = vpop.f32.mrf.mxu2 }
 0x114   : > { %v664_v40 = vmul.f32 %v1565_v32, %v611_v23  ;;  %v658_v62 = vmul.f32 %v1553_v55, %v596_v24  ;;  %v686_v23 = vld [vmem:[#allocation2] sm:$0xff] }
 0x116   : > { %v673_v49 = vpack.c.bf16 %v664_v40, %v663_v44  ;;  %v670_v7 = vpack.c.bf16 %v658_v62, %v657_v61 }
 0x11b   : > { %v614_v26 = vpop.f32.mrf.mxu3  ;;  %v599_v31 = vpop.f32.mrf.mxu2 }
 0x11c   : > { %v665_v36 = vmul.f32 %v1568_v28, %v614_v26  ;;  %v659_v56 = vmul.f32 %v1556_v47, %v599_v31 }
 0x123   : > { %v616_v34 = vpop.f32.mrf.mxu3  ;;  %v601_v50 = vpop.f32.mrf.mxu2 }
 0x124   : > { %v666_v37 = vmul.f32 %v1569_v29, %v616_v34  ;;  %v660_v57 = vmul.f32 %v1557_v48, %v601_v50 }
 0x126   : > { %v674_v41 = vpack.c.bf16 %v666_v37, %v665_v36  ;;  %v671_v63 = vpack.c.bf16 %v660_v57, %v659_v56 }
 0x128   : > { %687 = vmatpush.bf16.msra.mxu1 %v674_v41 }
 0x12c   : > { %688 = vmatpush.bf16.msra.mxu1 %v673_v49 }
 0x130   : > { %689 = vmatpush.bf16.msra.mxu1 %v672_v58 }
 0x134   : > { %690 = vmatpush.bf16.msra.mxu1 %v671_v63 }
 0x138   : > { %691 = vmatpush.bf16.msra.mxu1 %v670_v7 }
 0x13c   : > { %692 = vmatpush.bf16.msra.mxu1 %v669_v14 }
 0x140   : > { %693 = vmatpush.bf16.msra.mxu1 %v668_v20 }
 0x144   : > { %694 = vmatpush.bf16.msra.mxu1 %v667_v21 }
 0x147   : > { %1349 = vmatmul.msk.bf16.vlgmr.msra.gmra.mxu1 %vm1348_vm1, %v2078_v22 }
 0x1c4   : > { %v696_v24 = vpop.f32.mrf.mxu1 }
 0x1c5   : > { %v700_v26 = vadd.f32 %v696_v24, %v686_v23 }
 0x1c7   : > { %701 = vst [vmem:[#allocation2] sm:$0xff] %v700_v26 }
 0x1c8   : > { %705 = sbr.rel (%p1350_p1) target bundleno = 1119 (0x45f), region = 80 }
 0x1cc   : > { %v698_v27 = vpop.f32.mrf.mxu1 }
 0x1cd   : > { %v1513_v28 = vld [vmem:[#allocation11 + $0x38] sm:$0xff]  ;;  %v1512_v25 = vld [vmem:[#allocation11 + $0x30] sm:$0xff]  ;;  %v1511_v29 = vld [vmem:[#allocation11 + $0x28] sm:$0xff] }
 0x1ce   : > { %776 = vmatpush.bf16.msra.mxu0 %v1513_v28  ;;  %v1510_v30 = vld [vmem:[#allocation11 + $0x20] sm:$0xff]  ;;  %v1509_v31 = vld [vmem:[#allocation11 + $0x18] sm:$0xff]  ;;  %v1508_v32 = vld [vmem:[#allocation11 + $0x10] sm:$0xff] }
 0x1cf   : > { %v1507_v33 = vld [vmem:[#allocation11 + $0x8] sm:$0xff]  ;;  %v1506_v34 = vld [vmem:[#allocation11] sm:$0xff]  ;;  %v706_v35 = vld [vmem:[#allocation2] sm:$0xff] }
 0x1d0   : > { %v724_v36 = vpack.c.bf16 %v706_v35, %v706_v35  ;;  %v1521_v37 = vld [vmem:[#allocation11 + $0x78] sm:$0xff]  ;;  %v1520_v38 = vld [vmem:[#allocation11 + $0x70] sm:$0xff]  ;;  %v1519_v39 = vld [vmem:[#allocation11 + $0x68] sm:$0xff] }
 0x1d1   : > { %880 = vmatpush.bf16.msra.mxu1 %v1521_v37  ;;  %v1518_v40 = vld [vmem:[#allocation11 + $0x60] sm:$0xff]  ;;  %v1517_v41 = vld [vmem:[#allocation11 + $0x58] sm:$0xff]  ;;  %v1516_v42 = vld [vmem:[#allocation11 + $0x50] sm:$0xff] }
 0x1d2   : > { %777 = vmatpush.bf16.msra.mxu0 %v1512_v25  ;;  %v1515_v43 = vld [vmem:[#allocation11 + $0x48] sm:$0xff]  ;;  %v1514_v44 = vld [vmem:[#allocation11 + $0x40] sm:$0xff]  ;;  %v1741_v45 = vld [vmem:[%s2479_s22] ss:$0 sm:$0xff] }
 0x1d3   : > { %v1529_v0 = vld [vmem:[#allocation11 + $0xb8] sm:$0xff]  ;;  %v1528_v1 = vld [vmem:[#allocation11 + $0xb0] sm:$0xff]  ;;  %v1527_v2 = vld [vmem:[#allocation11 + $0xa8] sm:$0xff] }
 0x1d4   : > { %984 = vmatpush.bf16.msra.mxu2 %v1529_v0  ;;  %v1526_v3 = vld [vmem:[#allocation11 + $0xa0] sm:$0xff]  ;;  %v1525_v4 = vld [vmem:[#allocation11 + $0x98] sm:$0xff]  ;;  %v1524_v5 = vld [vmem:[#allocation11 + $0x90] sm:$0xff] }
 0x1d5   : > { %881 = vmatpush.bf16.msra.mxu1 %v1520_v38  ;;  %v1523_v6 = vld [vmem:[#allocation11 + $0x88] sm:$0xff]  ;;  %v1522_v7 = vld [vmem:[#allocation11 + $0x80] sm:$0xff]  ;;  %v1742_v8 = vld [vmem:[%s2479_s22 + $0x1] ss:$0 sm:$0xff] }
 0x1d6   : > { %778 = vmatpush.bf16.msra.mxu0 %v1511_v29  ;;  %v1537_v28 = vld [vmem:[#allocation12 + $0x38] sm:$0xff]  ;;  %v1536_v25 = vld [vmem:[#allocation12 + $0x30] sm:$0xff]  ;;  %v1535_v29 = vld [vmem:[#allocation12 + $0x28] sm:$0xff] }
 0x1d7   : > { %1082 = vmatpush.bf16.msra.mxu3 %v1537_v28  ;;  %v1743_v35 = vld [vmem:[%s2479_s22 + $0x2] ss:$0 sm:$0xff] }
 0x1d8   : > { %985 = vmatpush.bf16.msra.mxu2 %v1528_v1 }
 0x1d9   : > { %882 = vmatpush.bf16.msra.mxu1 %v1519_v39 }
 0x1da   : > { %779 = vmatpush.bf16.msra.mxu0 %v1510_v30  ;;  %v1534_v30 = vld [vmem:[#allocation12 + $0x20] sm:$0xff] }
 0x1db   : > { %1083 = vmatpush.bf16.msra.mxu3 %v1536_v25 }
 0x1dc   : > { %986 = vmatpush.bf16.msra.mxu2 %v1527_v2 }
 0x1dd   : > { %883 = vmatpush.bf16.msra.mxu1 %v1518_v40 }
 0x1de   : > { %780 = vmatpush.bf16.msra.mxu0 %v1509_v31  ;;  %v1533_v31 = vld [vmem:[#allocation12 + $0x18] sm:$0xff] }
 0x1df   : > { %1084 = vmatpush.bf16.msra.mxu3 %v1535_v29 }
 0x1e0   : > { %987 = vmatpush.bf16.msra.mxu2 %v1526_v3 }
 0x1e1   : > { %884 = vmatpush.bf16.msra.mxu1 %v1517_v41 }
 0x1e2   : > { %781 = vmatpush.bf16.msra.mxu0 %v1508_v32  ;;  %v1532_v32 = vld [vmem:[#allocation12 + $0x10] sm:$0xff] }
 0x1e3   : > { %1085 = vmatpush.bf16.msra.mxu3 %v1534_v30 }
 0x1e4   : > { %988 = vmatpush.bf16.msra.mxu2 %v1525_v4 }
 0x1e5   : > { %885 = vmatpush.bf16.msra.mxu1 %v1516_v42 }
 0x1e6   : > { %782 = vmatpush.bf16.msra.mxu0 %v1507_v33  ;;  %v1531_v33 = vld [vmem:[#allocation12 + $0x8] sm:$0xff] }
 0x1e7   : > { %1086 = vmatpush.bf16.msra.mxu3 %v1533_v31 }
 0x1e8   : > { %989 = vmatpush.bf16.msra.mxu2 %v1524_v5 }
 0x1e9   : > { %886 = vmatpush.bf16.msra.mxu1 %v1515_v43 }
 0x1ea   : > { %783 = vmatpush.bf16.msra.mxu0 %v1506_v34  ;;  %v1530_v34 = vld [vmem:[#allocation12] sm:$0xff] }
 0x1eb   : > { %1087 = vmatpush.bf16.msra.mxu3 %v1532_v32 }
 0x1ec   : > { %990 = vmatpush.bf16.msra.mxu2 %v1523_v6 }
 0x1ed   : > { %784 = vmatmul.bf16.vlgmr.msra.gmra.mxu0 %v724_v36  ;;  %887 = vmatpush.bf16.msra.mxu1 %v1514_v44 }
 0x1ef   : > { %1088 = vmatpush.bf16.msra.mxu3 %v1531_v33 }
 0x1f0   : > { %991 = vmatpush.bf16.msra.mxu2 %v1522_v7 }
 0x1f3   : > { %1089 = vmatpush.bf16.msra.mxu3 %v1530_v34 }
 0x26a   : > { %v785_v46 = vpop.f32.mrf.mxu0 }
 0x26b   : > { %v786_v47 = vadd.f32 %v1741_v45, %v785_v46 }
 0x26d   : > { %v1383_v48 = vmul.f32 -1.442695, %v786_v47 }
 0x26f   : > { %1744 = vpow2.f32 %v1383_v48 }
 0x272   : > { %v787_v49 = vpop.f32.mrf.mxu0 }
 0x275   : > { %v1745_v50 = vpop.eup %1744 }
 0x276   : > { %v792_v51 = vadd.f32 1.0, %v1745_v50 }
 0x278   : > { %1746 = vrcp.f32 %v792_v51  ;;  %v804_v55 = vand.u32 2147483648, %v792_v51  ;;  %v802_v57 = vand.u32 2147483647, %v792_v51  ;;  %vm798_vm3 = vweird.f32 %v792_v51 }
 0x27a   : > { %v805_v59 = vor.u32 1.1754944e-38, %v804_v55  ;;  %vm803_vm5 = vcmp.eq.f32.partialorder %v802_v57, 8.507059e+37 }
 0x27e   : > { %v1747_v52 = vpop.eup %1746 }
 0x27f   : > { %v794_v53 = vmul.f32 %v1747_v52, %v792_v51  ;;  %vm799_vm2 = vweird.f32 %v1747_v52 }
 0x280   : > { %vm800_vm4 = vmor %vm798_vm3, %vm799_vm2 }
 0x281   : > { %v795_v54 = vsub.f32 1.0, %v794_v53 }
 0x283   : > { %v796_v56 = vmul.f32 %v1747_v52, %v795_v54 }
 0x285   : > { %v797_v58 = vadd.f32 %v1747_v52, %v796_v56 }
 0x287   : > { %v801_v60 = vsel %vm800_vm4, %v1747_v52, %v797_v58 }
 0x288   : > { %v806_v61 = vsel %vm803_vm5, %v805_v59, %v801_v60 }
 0x289   : > { %v808_v62 = vmul.f32 %v806_v61, %v786_v47 }
 0x28b   : > { %v828_v63 = vpack.c.bf16 %v808_v62, %v808_v62 }
 0x28d   : > { %888 = vmatmul.bf16.vlgmr.msra.gmra.mxu1 %v828_v63 }
 0x30a   : > { %v889_v9 = vpop.f32.mrf.mxu1 }
 0x30b   : > { %v890_v10 = vadd.f32 %v1742_v8, %v889_v9 }
 0x30d   : > { %v1417_v11 = vmul.f32 -1.442695, %v890_v10 }
 0x30f   : > { %1748 = vpow2.f32 %v1417_v11 }
 0x312   : > { %v891_v12 = vpop.f32.mrf.mxu1 }
 0x315   : > { %v1749_v13 = vpop.eup %1748 }
 0x316   : > { %v896_v14 = vadd.f32 1.0, %v1749_v13 }
 0x318   : > { %1750 = vrcp.f32 %v896_v14  ;;  %v908_v18 = vand.u32 2147483648, %v896_v14  ;;  %v906_v20 = vand.u32 2147483647, %v896_v14  ;;  %vm902_vm7 = vweird.f32 %v896_v14 }
 0x31a   : > { %v909_v22 = vor.u32 1.1754944e-38, %v908_v18  ;;  %vm907_vm9 = vcmp.eq.f32.partialorder %v906_v20, 8.507059e+37 }
 0x31e   : > { %v1751_v15 = vpop.eup %1750 }
 0x31f   : > { %v898_v16 = vmul.f32 %v1751_v15, %v896_v14  ;;  %vm903_vm6 = vweird.f32 %v1751_v15 }
 0x320   : > { %vm904_vm8 = vmor %vm902_vm7, %vm903_vm6 }
 0x321   : > { %v899_v17 = vsub.f32 1.0, %v898_v16 }
 0x323   : > { %v900_v19 = vmul.f32 %v1751_v15, %v899_v17 }
 0x325   : > { %v901_v21 = vadd.f32 %v1751_v15, %v900_v19 }
 0x327   : > { %v905_v23 = vsel %vm904_vm8, %v1751_v15, %v901_v21 }
 0x328   : > { %v910_v24 = vsel %vm907_vm9, %v909_v22, %v905_v23 }
 0x329   : > { %v912_v26 = vmul.f32 %v910_v24, %v890_v10 }
 0x32b   : > { %v932_v27 = vpack.c.bf16 %v912_v26, %v912_v26 }
 0x32d   : > { %992 = vmatmul.bf16.vlgmr.msra.gmra.mxu2 %v932_v27 }
 0x3b0   : > { %v993_v36 = vpop.f32.mrf.mxu2 }
 0x3b1   : > { %v994_v37 = vadd.f32 %v1743_v35, %v993_v36 }
 0x3b3   : > { %v1451_v38 = vmul.f32 -1.442695, %v994_v37 }
 0x3b5   : > { %1752 = vpow2.f32 %v1451_v38 }
 0x3b8   : > { %v995_v39 = vpop.f32.mrf.mxu2 }
 0x3bb   : > { %v1753_v40 = vpop.eup %1752 }
 0x3bc   : > { %v1000_v41 = vadd.f32 1.0, %v1753_v40 }
 0x3be   : > { %1754 = vrcp.f32 %v1000_v41  ;;  %v1012_v45 = vand.u32 2147483648, %v1000_v41  ;;  %v1010_v47 = vand.u32 2147483647, %v1000_v41  ;;  %vm1006_vm11 = vweird.f32 %v1000_v41 }
 0x3c0   : > { %v1013_v49 = vor.u32 1.1754944e-38, %v1012_v45  ;;  %vm1011_vm13 = vcmp.eq.f32.partialorder %v1010_v47, 8.507059e+37 }
 0x3c4   : > { %v1755_v42 = vpop.eup %1754 }
 0x3c5   : > { %v1002_v43 = vmul.f32 %v1755_v42, %v1000_v41  ;;  %vm1007_vm10 = vweird.f32 %v1755_v42 }
 0x3c6   : > { %vm1008_vm12 = vmor %vm1006_vm11, %vm1007_vm10 }
 0x3c7   : > { %v1003_v44 = vsub.f32 1.0, %v1002_v43 }
 0x3c9   : > { %v1004_v46 = vmul.f32 %v1755_v42, %v1003_v44 }
 0x3cb   : > { %v1005_v48 = vadd.f32 %v1755_v42, %v1004_v46 }
 0x3cd   : > { %v1009_v50 = vsel %vm1008_vm12, %v1755_v42, %v1005_v48 }
 0x3ce   : > { %v1014_v51 = vsel %vm1011_vm13, %v1013_v49, %v1009_v50 }
 0x3cf   : > { %v1016_v52 = vmul.f32 %v1014_v51, %v994_v37 }
 0x3d1   : > { %v1017_v53 = vpack.c.bf16 %v1016_v52, %v1016_v52 }
 0x3d3   : > { %1090 = vmatmul.bf16.vlgmr.msra.gmra.mxu3 %v1017_v53 }
 0x456   : > { %v1091_v54 = vpop.f32.mrf.mxu3 }
 0x457   : > { %1095 = vst [vmem:[%s434_s23] sm:$0xff] %v1091_v54 }
 0x45e   : > { %v1093_v55 = vpop.f32.mrf.mxu3 }
 0x45f PF: > { %s2481_s18 = sld [smem:[#allocation34_spill]]  ;;  %s1109_s26 = sshll.u32 %s434_s23, 4  ;;  %s1110_s26 = int_to_ptr.vmem [resolvable:$true] %s1109_s26 }
 0x460   : > { %s1097_s21 = scalar_lea.sflag [#allocation5], %s432_s29 }
 0x465   : > { %s1107_s24 = scalar_lea.hbm %s2481_s18, %s1346_s7  ;;  %s1956_s10 = scalar_lea.hbm %s2481_s18, 24 }
 0x466   : > { %s1111_s13 = sshll.u32 %s1107_s24, 4  ;;  %s1112_s13 = int_to_ptr.hbm [resolvable:$true] %s1111_s13 }
 0x467   : > { %s1950_s19 = sshra.s32 %s1112_s13, 4  ;;  %s1951_s19 = int_to_ptr.hbm [resolvable:$true] %s1950_s19 }
 0x468   : > { %s1952_s3 = scalar_lea.hbm %s1951_s19, 8  ;;  %p1957_p4 = scmp.lt.s32.totalorder %s1951_s19, %s2481_s18 }
 0x469   : > { %p1953_p11 = scmp.ne.s32.totalorder %s1951_s19, %s1952_s3  ;;  %p1958_p5 = scmp.lt.s32.totalorder %s1956_s10, %s1952_s3 }
 0x46b   : > { %p1954_p13 = pnand %p1953_p11, %p2190_p7  ;;  %p1959_p6 = por %p1958_p5, %p1957_p4 }
 0x46d   : > { %p1955_p2 = pneg %p1954_p13 }
 0x46f   : > { %p1960_p8 = pnand %p1959_p6, %p1955_p2 }
 0x471   : > { %1963 = shalt.err (!%p1960_p8)
}
 0x472   : > { %1611 = dma.vmem_to_hbm [thread:$0]  (%p2190_p7), %s1110_s26, 128, %s1112_s13, %s1097_s21  }
 0x473 PF: > { %s2483_s29 = sld [smem:[#allocation20_spill]]  ;;  %p1644_p10 = scmp.ge.s32.totalorder %s2070_s11, 2 }
 0x475   : > { %p1634_p12 = pnand %p1644_p10, %p2195_p9 }
 0x477   : > { %p1635_p0 = pneg %p1634_p12 }
 0x479   : > { %s1123_s23 = sand.u32 1, %s2483_s29  }
 0x47a   : > { %s1124_s14 = scalar_lea.sflag [#allocation5], %s1123_s23 }
 0x47b   : > { %2025 = dma.done.wait (%p1635_p0), %s1124_s14, 128  }
 0x47c   : > { %2027 = vsyncadd (%p1635_p0), %s1124_s14, 4294967168  ;;  %s28_s11 = sadd.s32 1, %s2070_s11   ;;  %s2485_s5 = sld [smem:[#allocation21_spill]] }
 0x47d   : > { %p25_p3 = scmp.ge.s32.totalorder %s28_s11, 11   ;;  %s2486_s26 = sld [smem:[#allocation30_spill]] }
 0x47e   : > { %s2487_s17 = sld [smem:[#allocation22_spill]]  ;;  %s2492_s24 = smov %s2034_s25 }
 0x47f   : > { %s2488_s29 = sld [smem:[#allocation29_spill]]  ;;  %s2494_s27 = smov %s2046_s28 }
 0x480   : > { %s2489_s8 = sld [smem:[#allocation24_spill]]  ;;  %s2496_s30 = smov %s2062_s9 }
 0x481   : > { %s2490_s16 = sld [smem:[#allocation27_spill]] }
 0x482   : > { %s2491_s10 = sld [smem:[#allocation28_spill]]  ;;  %s2493_s25 = smov %s2485_s5 }
 0x483   :  { %27 = sbr.rel (!%p25_p3) target bundleno = 18 (0x12), region = 141 }
 0x484   : > { %s2495_s28 = smov %s2487_s17 }
 0x487   : > { %s2497_s9 = smov %s2490_s16 }
 0x488   :  { %1130 = vsyncpa [#allocation4], 1 }
 0x489   :  { %1132 = vsyncpa [#allocation4 + $0x1], 1 }
 0x48a   :  { %1133 = vsyncpa [#allocation7], 1 }
 0x48b   :  { %1135 = vsyncpa [#allocation7 + $0x1], 1 }
 0x48c   :  { %1136 = vsyncpa [#allocation10], 1 }
 0x48d   :  { %1137 = vsyncpa [#allocation13], 1 }
 0x48e   :  { %1138 = vsyncpa [#allocation5], 1 }
 0x48f   :  { %1140 = vsyncpa [#allocation5 + $0x1], 1 }

</bundles_post_ra>
